<compile_context>
chip_gen: v7x
topology: tpu7x:2x2x1
jax: 0.10.0
libtpu: 0.0.40
codegen_flags: <defaults>
</compile_context>

<pallas_src>
import functools

import jax
import jax.numpy as jnp
from jax.experimental import pallas as pl
from jax.experimental.pallas import tpu as pltpu


def pa_kernel(x_ref, w1_ref, b1_ref, w2_ref, b2_ref, o_ref):
    # x_ref : (nb, C, tp)  VMEM  -- nb images' channels x pixel tile
    # w1_ref: (Ch, C)      VMEM  -- conv1 1x1 weight (Cout, Cin)
    # b1_ref: (Ch, 1)      VMEM  -- conv1 bias (column vector)
    # w2_ref: (Ch, 1)      VMEM  -- conv2 1x1 weight (Cout = 1, squeezed)
    # b2_ref: (1,)         SMEM  -- conv2 bias
    # o_ref : (nb, C, tp)  VMEM
    nb = x_ref.shape[0]
    ch = w1_ref.shape[0]
    tp = x_ref.shape[-1]

    w1 = w1_ref[...]                                        # (Ch, C)
    # Hoist lane-broadcasts of the tiny bias/weight vectors out of the nb loop.
    b1 = jnp.broadcast_to(b1_ref[...], (ch, tp)).astype(jnp.float32)
    w2 = jnp.broadcast_to(w2_ref[...], (ch, tp)).astype(jnp.float32)
    b2 = b2_ref[0]

    for b in range(nb):  # small static unroll over images in this block
        x = x_ref[b]                                        # (C, tp), native dtype
        # conv1 on the MXU, f32 accumulation; no full-tile cast of x.
        h = jnp.dot(w1, x, preferred_element_type=jnp.float32)     # (Ch, tp)
        h = jnp.maximum(h + b1, 0.0)                                # bias + ReLU
        # conv2 (Ch -> 1): scale + cross-sublane reduce, then bias + sigmoid.
        z = jnp.sum(w2 * h, axis=0, keepdims=True) + b2             # (1, tp)
        y = jax.nn.sigmoid(z)                                       # (1, tp) f32
        # Pixel attention: broadcast y over the channel (sublane) axis.
        o_ref[b] = (x * y.astype(x.dtype)).astype(o_ref.dtype)


def _choose_blocking(N, C, P, itemsize, *, tp_max=16384, nb_max=16,
                     tile_budget_bytes=4 << 20, step_bytes_target=2 << 20):
    """Pick (nb, tp): batch-block and pixel-tile sizes for one grid step."""
    # Lane (pixel) tile: cap so one tile stays within the per-array VMEM budget
    # (4 MiB -> in+out double-buffered ~16 MiB, safe on v7x's 64 MiB VMEM).
    lane_cap = max(128, ((tile_budget_bytes // max(C * itemsize, 1)) // 128) * 128)
    tp_hi = max(128, min((tp_max // 128) * 128, lane_cap))
    tp = P if P <= tp_hi else tp_hi

    # Batch blocking: when whole images are tiny, pack several per grid step so
    # each step moves ~MiB-scale HBM traffic (amortizes ~0.35us/step overhead).
    nb = 1
    if tp == P:
        per_image = C * P * itemsize
        if per_image < step_bytes_target:
            nb = int(max(1, min(N, nb_max, step_bytes_target // max(per_image, 1))))

    # Keep at least 2 grid steps so both v7x TensorCores get work.
    def steps(nb_, tp_):
        return (-(-N // nb_)) * (-(-P // tp_))

    while nb > 1 and steps(nb, tp) < 2:
        nb //= 2
    if steps(nb, tp) < 2 and tp == P and P >= 256:
        tp = max(128, ((-(-P // 2) + 127) // 128) * 128)
    return int(nb), int(tp)


@functools.partial(jax.jit, static_argnames=("tp_max",))
def pa_layer(x_nchw, w1, b1, w2, b2, *, tp_max=16384):
    """PALayer forward.

    x_nchw: (N, C, H, W)
    w1    : (C//8, C)  conv1 1x1 weight in PyTorch (Cout, Cin) layout
    b1    : (C//8,)    conv1 bias
    w2    : (C//8,)    conv2 1x1 weight (Cout = 1, squeezed)
    b2    : ()         conv2 bias
    """
    N, C, H, W = x_nchw.shape
    Ch = w1.shape[0]
    P = H * W
    itemsize = jnp.dtype(x_nchw.dtype).itemsize

    nb, tp = _choose_blocking(N, C, P, itemsize, tp_max=tp_max)
    grid = (pl.cdiv(N, nb), pl.cdiv(P, tp))

    # Native NCHW flatten -- free reshape, no transposes.
    x3d = x_nchw.reshape(N, C, P)
    # Weights: match x's dtype when bf16 (MXU bf16 inputs, f32 acc), else f32.
    w_dtype = jnp.bfloat16 if x_nchw.dtype == jnp.bfloat16 else jnp.float32
    w1_in = w1.reshape(Ch, C).astype(w_dtype)
    b1_in = b1.reshape(Ch, 1).astype(jnp.float32)
    w2_in = w2.reshape(Ch, 1).astype(jnp.float32)
    b2_in = b2.reshape(1).astype(jnp.float32)

    cost = pl.CostEstimate(
        flops=2 * N * P * Ch * (C + 1),
        transcendentals=N * P,
        bytes_accessed=2 * N * C * P * itemsize,
    )

    out3d = pl.pallas_call(
        pa_kernel,
        out_shape=jax.ShapeDtypeStruct((N, C, P), x_nchw.dtype),
        grid=grid,
        in_specs=[
            pl.BlockSpec((nb, C, tp), lambda n, j: (n, 0, j)),      # x tile
            pl.BlockSpec((Ch, C), lambda n, j: (0, 0)),             # w1
            pl.BlockSpec((Ch, 1), lambda n, j: (0, 0)),             # b1
            pl.BlockSpec((Ch, 1), lambda n, j: (0, 0)),             # w2
            pl.BlockSpec(memory_space=pltpu.MemorySpace.SMEM),      # b2
        ],
        out_specs=pl.BlockSpec((nb, C, tp), lambda n, j: (n, 0, j)),
        compiler_params=pltpu.CompilerParams(
            dimension_semantics=("parallel", "parallel"),
            vmem_limit_bytes=32 * 1024 * 1024,
        ),
        cost_estimate=cost,
    )(x3d, w1_in, b1_in, w2_in, b2_in)

    return out3d.reshape(N, C, H, W)


def pa_layer_ref(x_nchw, w1, b1, w2, b2):
    """Pure-JAX reference matching the PyTorch module."""
    xf = x_nchw.astype(jnp.float32)
    h = jnp.einsum("oc,nchw->nohw", w1.astype(jnp.float32), xf)
    h = jnp.maximum(h + b1[None, :, None, None], 0.0)
    y = jax.nn.sigmoid(
        jnp.einsum("o,nohw->nhw", w2.astype(jnp.float32), h)[:, None, :, :] + b2
    )
    return (xf * y).astype(x_nchw.dtype)


def _run_case(key, N, C, H, W):
    Ch = C // 8
    kx, kw1, kb1, kw2, kb2 = jax.random.split(key, 5)
    x = jax.random.normal(kx, (N, C, H, W), dtype=jnp.float32)
    # 1x1 conv weights in PyTorch (Cout, Cin) layout (kernel dims squeezed).
    w1 = jax.random.normal(kw1, (Ch, C), dtype=jnp.float32) * 0.1
    b1 = jax.random.normal(kb1, (Ch,), dtype=jnp.float32) * 0.1
    w2 = jax.random.normal(kw2, (Ch,), dtype=jnp.float32) * 0.1
    b2 = jax.random.normal(kb2, (), dtype=jnp.float32) * 0.1

    out = jax.block_until_ready(pa_layer(x, w1, b1, w2, b2))
    ref = jax.block_until_ready(pa_layer_ref(x, w1, b1, w2, b2))
    assert out.shape == (N, C, H, W)
    assert jnp.allclose(out, ref, atol=1e-4, rtol=1e-4), (
        f"mismatch at shape {(N, C, H, W)}"
    )


if __name__ == "__main__":
    key = jax.random.PRNGKey(0)
    k0, k1, k2 = jax.random.split(key, 3)

    # PALayer(channel=32): conv1 32 -> 4 (1x1), conv2 4 -> 1 (1x1)
    _run_case(k0, N=2, C=32, H=16, W=16)   # main case; >=2 grid steps
    _run_case(k1, N=5, C=32, H=8, W=8)     # batch-blocked with ragged batch tail
    _run_case(k2, N=1, C=16, H=40, W=40)   # pixel-axis split with ragged tail

    print("KERNEL_OK")
</pallas_src>

<mosaic_0001>
module attributes {stable_mosaic.version = 11 : i64} {
  func.func @pa_kernel(%arg0: i32, %arg1: i32, %arg2: memref<1x32x256xf32, #tpu.memory_space<vmem>>, %arg3: memref<4x32xf32, #tpu.memory_space<vmem>>, %arg4: memref<4x1xf32, #tpu.memory_space<vmem>>, %arg5: memref<4x1xf32, #tpu.memory_space<vmem>>, %arg6: memref<1xf32, #tpu.memory_space<smem>>, %arg7: memref<1x32x256xf32, #tpu.memory_space<vmem>>) attributes {dimension_semantics = [#tpu.dimension_semantics<parallel>, #tpu.dimension_semantics<parallel>], iteration_bounds = array<i64: 2, 1>, scalar_prefetch = 0 : i64, scratch_operands = 0 : i64, tpu.core_type = #tpu.core_type<tc>, window_params = [{transform_indices = @transform_0, window_bounds = array<i64: 1, 32, 256>}, {pipeline_mode = #tpu.pipeline_mode<synchronous>, transform_indices = @transform_1, window_bounds = array<i64: 4, 32>}, {pipeline_mode = #tpu.pipeline_mode<synchronous>, transform_indices = @transform_2, window_bounds = array<i64: 4, 1>}, {pipeline_mode = #tpu.pipeline_mode<synchronous>, transform_indices = @transform_3, window_bounds = array<i64: 4, 1>}, {transform_indices = @transform_4, window_bounds = array<i64: 1>}, {transform_indices = @transform_5, window_bounds = array<i64: 1, 32, 256>}]} {
    %c0 = arith.constant 0 : index
    %c0_0 = arith.constant 0 : index
    %0 = vector.load %arg3[%c0, %c0_0] : memref<4x32xf32, #tpu.memory_space<vmem>>, vector<4x32xf32>
    %c0_1 = arith.constant 0 : index
    %c0_2 = arith.constant 0 : index
    %1 = vector.load %arg4[%c0_1, %c0_2] : memref<4x1xf32, #tpu.memory_space<vmem>>, vector<4x1xf32>
    %2 = vector.shape_cast %1 : vector<4x1xf32> to vector<4x1xf32>
    %3 = vector.broadcast %2 : vector<4x1xf32> to vector<4x256xf32>
    %c0_3 = arith.constant 0 : index
    %c0_4 = arith.constant 0 : index
    %4 = vector.load %arg5[%c0_3, %c0_4] : memref<4x1xf32, #tpu.memory_space<vmem>>, vector<4x1xf32>
    %5 = vector.shape_cast %4 : vector<4x1xf32> to vector<4x1xf32>
    %6 = vector.broadcast %5 : vector<4x1xf32> to vector<4x256xf32>
    %c0_5 = arith.constant 0 : index
    %7 = memref.load %arg6[%c0_5] : memref<1xf32, #tpu.memory_space<smem>>
    %c0_6 = arith.constant 0 : index
    %c0_7 = arith.constant 0 : index
    %c0_8 = arith.constant 0 : index
    %8 = vector.load %arg2[%c0_6, %c0_7, %c0_8] : memref<1x32x256xf32, #tpu.memory_space<vmem>>, vector<1x32x256xf32>
    %9 = vector.shape_cast %8 : vector<1x32x256xf32> to vector<32x256xf32>
    %cst = arith.constant dense<0.000000e+00> : vector<4x256xf32>
    %10 = tpu.matmul %0, %9, %cst {dimension_numbers = #tpu.dot_dimension_numbers<[1], [0], [0], [1], [0, 0, 1, 1], [], []>} : vector<4x32xf32>, vector<32x256xf32>, vector<4x256xf32> -> vector<4x256xf32>
    %11 = arith.addf %10, %3 : vector<4x256xf32>
    %cst_9 = arith.constant 0.000000e+00 : f32
    %12 = vector.broadcast %cst_9 : f32 to vector<4x256xf32>
    %13 = arith.maximumf %11, %12 : vector<4x256xf32>
    %14 = arith.mulf %6, %13 : vector<4x256xf32>
    %cst_10 = arith.constant dense<0.000000e+00> : vector<256xf32>
    %15 = vector.multi_reduction <add>, %14, %cst_10 [0] : vector<4x256xf32> to vector<256xf32>
    %16 = vector.shape_cast %15 : vector<256xf32> to vector<1x256xf32>
    %17 = vector.broadcast %7 : f32 to vector<1x256xf32>
    %18 = arith.addf %16, %17 : vector<1x256xf32>
    %19 = arith.negf %18 : vector<1x256xf32>
    %20 = math.exp %19 : vector<1x256xf32>
    %cst_11 = arith.constant 1.000000e+00 : f32
    %21 = vector.broadcast %cst_11 : f32 to vector<1x256xf32>
    %22 = arith.addf %21, %20 : vector<1x256xf32>
    %23 = arith.divf %21, %22 : vector<1x256xf32>
    %24 = vector.broadcast %23 : vector<1x256xf32> to vector<32x256xf32>
    %25 = arith.mulf %9, %24 : vector<32x256xf32>
    %c0_12 = arith.constant 0 : index
    %c0_13 = arith.constant 0 : index
    %c0_14 = arith.constant 0 : index
    %26 = vector.load %arg7[%c0_12, %c0_13, %c0_14] : memref<1x32x256xf32, #tpu.memory_space<vmem>>, vector<1x32x256xf32>
    %27 = vector.shape_cast %26 : vector<1x32x256xf32> to vector<32x256xf32>
    %28 = vector.shape_cast %25 : vector<32x256xf32> to vector<1x32x256xf32>
    tpu.vector_store %arg7[%c0_12, %c0_13, %c0_14], %28 {strides = array<i32>} : memref<1x32x256xf32, #tpu.memory_space<vmem>>, vector<1x32x256xf32>,
    return
  }
  func.func @transform_0(%arg0: i32, %arg1: i32) -> (i32, i32, i32) {
    %c0_i32 = arith.constant 0 : i32
    %c0_i32_0 = arith.constant 0 : i32
    return %arg0, %c0_i32, %arg1 : i32, i32, i32
  }
  func.func @transform_1(%arg0: i32, %arg1: i32) -> (i32, i32) {
    %c0_i32 = arith.constant 0 : i32
    %c0_i32_0 = arith.constant 0 : i32
    %c0_i32_1 = arith.constant 0 : i32
    return %c0_i32, %c0_i32_0 : i32, i32
  }
  func.func @transform_2(%arg0: i32, %arg1: i32) -> (i32, i32) {
    %c0_i32 = arith.constant 0 : i32
    %c0_i32_0 = arith.constant 0 : i32
    %c0_i32_1 = arith.constant 0 : i32
    return %c0_i32, %c0_i32_0 : i32, i32
  }
  func.func @transform_3(%arg0: i32, %arg1: i32) -> (i32, i32) {
    %c0_i32 = arith.constant 0 : i32
    %c0_i32_0 = arith.constant 0 : i32
    %c0_i32_1 = arith.constant 0 : i32
    return %c0_i32, %c0_i32_0 : i32, i32
  }
  func.func @transform_4(%arg0: i32, %arg1: i32) -> i32 {
    %c0_i32 = arith.constant 0 : i32
    %c0_i32_0 = arith.constant 0 : i32
    return %c0_i32 : i32
  }
  func.func @transform_5(%arg0: i32, %arg1: i32) -> (i32, i32, i32) {
    %c0_i32 = arith.constant 0 : i32
    %c0_i32_0 = arith.constant 0 : i32
    return %arg0, %c0_i32, %arg1 : i32, i32, i32
  }
}

</mosaic_0001>

<bundles_post_ra>
// kernel: pa_layer.1
= control target key start
LH: loop header
LB: loop body
LE: loop exit
PB: predicated region body
PF: predicated region fallthrough
CT: control target
= control target key end

     0   :  { %s617_s20 = smov 0   ;;  %s619_s21 = smov 0   ;;  %s674_s0 = inlined_call_operand.vmem [shape: f32[2,32,256], index: 0, kind: input, shape index: {}]   ;;  %s675_s1 = inlined_call_operand.vmem [shape: f32[4,32], index: 1, kind: input, shape index: {}]   ;;  %s676_s2 = inlined_call_operand.vmem [shape: f32[4,1], index: 2, kind: input, shape index: {}]   ;;  %s677_s3 = inlined_call_operand.vmem [shape: f32[4,1], index: 3, kind: input, shape index: {}]   ;;  %s678_s4 = inlined_call_operand.<no memory space> [shape: f32[1], index: 4, kind: input, shape index: {}]   ;;  %s679_s5 = inlined_call_operand.vmem [shape: f32[2,32,256], index: 5, kind: output, shape index: {}]  }
   0x1   :  { %10 = sst [smem:[#allocation2]] %s678_s4  ;;  %s621_s22 = smov 0  }
   0x2 LB: > { %s28_s4 = sadd.s32 1, %s576_s21  ;;  %p503_p0 = scmp.ge.s32.totalorder %s580_s22, 1  ;;  %s580_s22 = sphi %s621_s22, %s16_s22   ;;  %s576_s21 = sphi %s619_s21, %s681_s21   ;;  %s572_s20 = sphi %s617_s20, %s680_s20  }
   0x3   : > { %p30_p1 = scmp.ge.s32.totalorder %s28_s4, 2  ;;  %p209_p2 = scmp.lt.s32.totalorder %s580_s22, 3 }
   0x5   : > { %s683_s4 = smov (%p30_p1, %s28_s4), 0  ;;  %p210_p3 = pnand %p503_p0, %p209_p2 }
   0x6   : > { %p246_p4 = scmp.lt.s32.totalorder (!%p210_p3), %s572_s20, 1  ;;  %v582_v0 = vmov (!%p210_p3), 0.0   ;;  %v583_v1 = vmov (!%p210_p3), 0   ;;  %v266_v2 = vld [vmem:[%s676_s2] sm:$0xf] (!%p210_p3)  ;;  %vm287_vm0 = vcmask (!%p210_p3), 261120  }
   0x7   : > { %213 = sbr.rel (%p210_p3) target bundleno = 293 (0x125), region = 40  ;;  %355 = vmatprep.mubr.f32.mxu0 (!%p210_p3), %v582_v0  ;;  %549 = vset.pattern.permute.xlu0 (!%p210_p3), %v583_v1  ;;  %v272_v3 = vld [vmem:[%s677_s3] sm:$0xf] (!%p210_p3)  ;;  %vm366_vm1 = vcmask (!%p210_p3), 1043456   ;;  %s278_s8 = sld [smem:[#allocation2]] (!%p210_p3) }
   0x8   : > { %269 = vperm.xlu0 (!%p210_p3), %549, %v266_v2   ;;  %v265_v16 = vld [vmem:[%s675_s1] sm:$0xf] (!%p210_p3) }
   0xc   : > { %275 = vperm.xlu0 (!%p210_p3), %549, %v272_v3  }
   0xd   : > { %v381_v38 = vstv (!%p210_p3), %s278_s8 }
   0xe   : > { %s685_s20 = smov (!%p246_p4, %s572_s20), 1 }
   0xf   : > { %s513_s27 = sshll.u32 %s685_s20, 6 }
  0x10   : > { %s253_s30 = scalar_lea.vmem %s674_s0, %s513_s27  ;;  %s263_s11 = scalar_lea.vmem %s679_s5, %s513_s27 }
  0x11   : > { %v649_v4 = vld [vmem:[%s253_s30 + $0x8] sm:$0xff]  ;;  %v651_v5 = vld [vmem:[%s253_s30 + $0x18] sm:$0xff]  ;;  %v279_v6 = vld [vmem:[%s253_s30] sm:$0xff] }
  0x12   : > { %v515_v7 = vpack.c.bf16 %v651_v5, %v649_v4  ;;  %v281_v8 = vld [vmem:[%s253_s30 + $0x10] sm:$0xff]  ;;  %v284_v9 = vld [vmem:[%s253_s30 + $0x28] sm:$0xff]  ;;  %v286_v10 = vld [vmem:[%s253_s30 + $0x38] sm:$0xff] }
  0x13   : > { %v517_v11 = vpack.c.bf16 %v281_v8, %v279_v6  ;;  %v519_v12 = vpack.c.bf16 %v286_v10, %v284_v9  ;;  %v283_v13 = vld [vmem:[%s253_s30 + $0x20] sm:$0xff]  ;;  %v285_v14 = vld [vmem:[%s253_s30 + $0x30] sm:$0xff] }
  0x14   : > { %516 = vmatprep.subr.bf16.mxu0 %v515_v7  ;;  %v521_v15 = vpack.c.bf16 %v285_v14, %v283_v13 }
  0x15   : > { %518 = vmatpush1.bf16.msra.mxu0 %v517_v11 }
  0x16   : > { %520 = vmatprep.subr.bf16.mxu0 %v519_v12 }
  0x19   : > { %522 = vmatpush1.bf16.msra.mxu0 %v521_v15 }
  0x1c   : > { %508 = vmatmul.mubr.msk.f32.vlgmr.msra.gmra.mrb[0].mxu0 %vm287_vm0, %v265_v16 }
  0x87   : > { %v270_v17 = vpop.permute.xlu0 %269 }
  0x8b   : > { %v276_v23 = vpop.permute.xlu0 %275 }
  0xef   : > { %v357_v18 = vpop.f32.mrb[0].mxu0 }
  0xf0   : > { %v358_v19 = vadd.f32 %v357_v18, %v270_v17  ;;  %v359_v20 = vpop.f32.mrb[1].mxu0 }
  0xf1   : > { %v360_v21 = vadd.f32 %v359_v20, %v270_v17 }
  0xf2   : > { %v362_v22 = vmax.f32 %v358_v19, 0.0 }
  0xf3   : > { %v363_v24 = vmax.f32 %v360_v21, 0.0 }
  0xf4   : > { %v364_v25 = vmul.f32 %v362_v22, %v276_v23 }
  0xf5   : > { %v365_v26 = vmul.f32 %v363_v24, %v276_v23 }
  0xf6   : > { %v367_v27 = vsel %vm366_vm1, %v364_v25, 0.0 }
  0xf7   : > { %v368_v28 = vrot.slane %v367_v27, 4  ;;  %v374_v29 = vsel %vm366_vm1, %v365_v26, 0.0 }
  0xf8   : > { %v375_v30 = vrot.slane %v374_v29, 4 }
  0xf9   : > { %v369_v31 = vadd.f32 %v368_v28, %v367_v27 }
  0xfa   : > { %v376_v32 = vadd.f32 %v375_v30, %v374_v29 }
  0xfb   : > { %v370_v33 = vrot.slane %v369_v31, 2 }
  0xfc   : > { %v377_v34 = vrot.slane %v376_v32, 2 }
  0xfd   : > { %v371_v35 = vadd.f32 %v370_v33, %v369_v31 }
  0xfe   : > { %v378_v36 = vadd.f32 %v377_v34, %v376_v32 }
  0xff   : > { %v372_v37 = vrot.slane %v371_v35, 1 }
 0x100   : > { %v379_v39 = vrot.slane %v378_v36, 1 }
 0x101   : > { %v373_v40 = vadd.f32 %v372_v37, %v371_v35 }
 0x102   : > { %v380_v41 = vadd.f32 %v379_v39, %v378_v36 }
 0x103   : > { %v382_v42 = vadd.f32 %v381_v38, %v373_v40 }
 0x104   : > { %v383_v43 = vadd.f32 %v381_v38, %v380_v41 }
 0x105   : > { %v509_v44 = vmul.f32 -1.442695, %v382_v42 }
 0x106   : > { %v510_v45 = vmul.f32 -1.442695, %v383_v43 }
 0x107   : > { %550 = vpow2.f32 %v509_v44 }
 0x108   : > { %552 = vpow2.f32 %v510_v45 }
 0x111   : > { %v551_v46 = vpop.eup %550 }
 0x112   : > { %v553_v47 = vpop.eup %552  ;;  %v390_v48 = vadd.f32 1.0, %v551_v46 }
 0x113   : > { %v391_v49 = vadd.f32 1.0, %v553_v47 }
 0x114   : > { %554 = vrcp.f32 %v390_v48 }
 0x115   : > { %556 = vrcp.f32 %v391_v49 }
 0x11e   : > { %v555_v50 = vpop.eup %554 }
 0x11f   : > { %v557_v51 = vpop.eup %556  ;;  %v396_v52 = vmul.f32 %v555_v50, %v279_v6  ;;  %v398_v53 = vmul.f32 %v555_v50, %v281_v8  ;;  %v400_v54 = vmul.f32 %v555_v50, %v283_v13  ;;  %v402_v55 = vmul.f32 %v555_v50, %v285_v14 }
 0x120   : > { %v397_v56 = vmul.f32 %v557_v51, %v649_v4  ;;  %v399_v57 = vmul.f32 %v557_v51, %v651_v5  ;;  %v401_v58 = vmul.f32 %v557_v51, %v284_v9  ;;  %v403_v59 = vmul.f32 %v557_v51, %v286_v10 }
 0x121   : > { %404 = vst [vmem:[%s263_s11] sm:$0xff] %v396_v52  ;;  %406 = vst [vmem:[%s263_s11 + $0x10] sm:$0xff] %v398_v53 }
 0x122   : > { %408 = vst [vmem:[%s263_s11 + $0x20] sm:$0xff] %v400_v54  ;;  %410 = vst [vmem:[%s263_s11 + $0x30] sm:$0xff] %v402_v55 }
 0x123   : > { %405 = vst [vmem:[%s263_s11 + $0x8] sm:$0xff] %v397_v56  ;;  %407 = vst [vmem:[%s263_s11 + $0x18] sm:$0xff] %v399_v57 }
 0x124   : > { %409 = vst [vmem:[%s263_s11 + $0x28] sm:$0xff] %v401_v58  ;;  %411 = vst [vmem:[%s263_s11 + $0x38] sm:$0xff] %v403_v59 }
 0x125 PF: > { %s16_s22 = sadd.s32 1, %s580_s22   ;;  %s680_s20 = smov %s576_s21 }
 0x126   : > { %p13_p5 = scmp.ge.s32.totalorder %s16_s22, 4   ;;  %s681_s21 = smov %s683_s4 }
 0x128   :  { %15 = sbr.rel (!%p13_p5) target bundleno = 2 (0x2), region = 70 }

</bundles_post_ra>
